<compile_context>
chip_gen: v7x
topology: tpu7x:2x2x1
jax: 0.10.0
libtpu: 0.0.40
codegen_flags: <defaults>
</compile_context>

<pallas_src>
import jax
import jax.numpy as jnp
from jax.experimental import pallas as pl
from jax.experimental.pallas import tpu as pltpu


def _packed_kernel(x_ref, w_ref, b_ref, o_ref):
    # x_ref: (TB, 128) VMEM tile, all lanes live (k original rows per packed row)
    # w_ref: (128, k)  resident block-diagonal weight (f32)
    # b_ref: (1,)      SMEM scalar bias (f32)
    # o_ref: (TB, k)   lane-packed sigmoid output
    x = x_ref[...].astype(jnp.float32)
    logits = jnp.dot(x, w_ref[...], preferred_element_type=jnp.float32)  # MXU
    o_ref[...] = jax.nn.sigmoid(logits + b_ref[0]).astype(o_ref.dtype)   # EUP


def _generic_kernel(x_ref, w_ref, b_ref, o_ref):
    # x_ref: (TB, D) VMEM tile; w_ref: (1, D) resident f32 row; o_ref: (TB, 1)
    x = x_ref[...].astype(jnp.float32)
    logits = jnp.sum(x * w_ref[...], axis=-1, keepdims=True)   # VPU mul + XLU reduce
    o_ref[...] = jax.nn.sigmoid(logits + b_ref[0]).astype(o_ref.dtype)


def _choose_rows_tile(rows, row_bytes, forced=None):
    """Rows per grid step of the streamed view.

    ~8 MiB per (double-buffered) x buffer, multiple of 8 sublanes, capped at
    ~rows/2 so the parallel grid can be split across two TensorCores (v7x).
    If a single block covers everything, use the exact row count (block dim ==
    full array dim satisfies the layout rule, no ragged block needed)."""
    if forced is not None:
        tb = max(8, (int(forced) // 8) * 8)
    else:
        target_bytes = 8 * 1024 * 1024
        tb = max(8, (target_bytes // max(row_bytes, 1)) // 8 * 8)
        half = ((pl.cdiv(rows, 2) + 7) // 8) * 8
        tb = min(tb, max(8, half))
    if tb >= rows:
        tb = rows
    return int(tb)


def aud_model_forward(x, w, b, *, batch_tile=None):
    """Pallas equivalent of aud_Model.forward: sigmoid(x @ W^T + b).

    x: (B, D) activations; w: (1, D) PyTorch nn.Linear(D, 1) weight; b: (1,)/()
    returns (B, 1) in x.dtype.
    """
    B, D = x.shape
    w32 = jnp.asarray(w, jnp.float32).reshape(1, D)   # keep weight f32 (no bf16 round-trip)
    b32 = jnp.asarray(b, jnp.float32).reshape(1)      # SMEM scalar
    out_dtype = x.dtype
    itemsize = x.dtype.itemsize

    cost = pl.CostEstimate(
        flops=2 * B * D,
        transcendentals=2 * B,                         # sigmoid ~ exp + recip
        bytes_accessed=B * D * itemsize + 4 * (D + 1) + B * itemsize,
    )

    # Lane-packed MXU path: pack k = 128/D original rows into one 128-lane row.
    k = (128 // D) if (D <= 128 and 128 % D == 0) else 1
    if k > 1 and B % k == 0:
        rows, lanes = B // k, k * D                    # lanes == 128
        x_v = x.reshape(rows, lanes)                   # free, contiguous reshape
        w_bd = jnp.kron(jnp.eye(k, dtype=jnp.float32), w32.reshape(D, 1))  # (128, k)
        tb = _choose_rows_tile(rows, lanes * itemsize, batch_tile)
        vmem_limit = int(min(64 << 20, max(32 << 20, 2 * tb * lanes * itemsize + (2 << 20))))
        out = pl.pallas_call(
            _packed_kernel,
            out_shape=jax.ShapeDtypeStruct((rows, k), out_dtype),
            grid=(pl.cdiv(rows, tb),),
            in_specs=[
                pl.BlockSpec((tb, lanes), lambda i: (i, 0)),           # streamed x
                pl.BlockSpec((lanes, k), lambda i: (0, 0)),            # resident weight
                pl.BlockSpec(memory_space=pltpu.MemorySpace.SMEM),     # scalar bias
            ],
            out_specs=pl.BlockSpec((tb, k), lambda i: (i, 0)),
            compiler_params=pltpu.CompilerParams(
                dimension_semantics=("parallel",),
                vmem_limit_bytes=vmem_limit,
            ),
            cost_estimate=cost,
        )(x_v, w_bd, b32)
        return out.reshape(B, 1)                       # free reshape back to (B, 1)

    # Generic path: any D, ragged grid over the unpadded batch.
    # TODO(synk): for very large rep_dim (D in the 100k+ range), add a second
    # reduction grid axis over D with an f32 accumulator instead of one (tb, D) tile.
    tb = _choose_rows_tile(B, D * itemsize, batch_tile)
    vmem_limit = int(min(64 << 20, max(32 << 20, 2 * tb * D * itemsize + (2 << 20))))
    out = pl.pallas_call(
        _generic_kernel,
        out_shape=jax.ShapeDtypeStruct((B, 1), out_dtype),
        grid=(pl.cdiv(B, tb),),
        in_specs=[
            pl.BlockSpec((tb, D), lambda i: (i, 0)),                   # streamed x
            pl.BlockSpec((1, D), lambda i: (0, 0)),                    # resident weight
            pl.BlockSpec(memory_space=pltpu.MemorySpace.SMEM),         # scalar bias
        ],
        out_specs=pl.BlockSpec((tb, 1), lambda i: (i, 0)),
        compiler_params=pltpu.CompilerParams(
            dimension_semantics=("parallel",),
            vmem_limit_bytes=vmem_limit,
        ),
        cost_estimate=cost,
    )(x, w32, b32)
    return out


def init_params(rep_dim, key):
    """Deterministic init matching nn.Linear(rep_dim, 1) shapes/ranges."""
    kw, kb = jax.random.split(key)
    bound = 1.0 / jnp.sqrt(jnp.float32(rep_dim))
    w = jax.random.uniform(kw, (1, rep_dim), jnp.float32, -bound, bound)
    b = jax.random.uniform(kb, (1,), jnp.float32, -bound, bound)
    return w, b


def reference_forward(x, w, b):
    return jax.nn.sigmoid(x @ w.T + b)


# TODO(synk): freeze()/melt() only toggle requires_grad (training concern); no
# forward-pass equivalent to implement in a kernel.


if __name__ == "__main__":
    key = jax.random.PRNGKey(0)
    k_x1, k_x2, k_x3, k_p1, k_p2 = jax.random.split(key, 5)

    # Case 1: D=32 divides 128, B%4==0 -> lane-packed MXU path, single block.
    B1, D1 = 20, 32
    x1 = jax.random.normal(k_x1, (B1, D1), jnp.float32)
    w1, b1 = init_params(D1, k_p1)
    ref1 = reference_forward(x1, w1, b1)
    out1 = jax.block_until_ready(aud_model_forward(x1, w1, b1))
    assert out1.shape == (B1, 1)
    assert jnp.allclose(out1, ref1, atol=1e-5, rtol=1e-5)

    # Case 2: packed path with a forced small tile -> multi-step grid + ragged last block.
    B2 = 80
    x2 = jax.random.normal(k_x2, (B2, D1), jnp.float32)
    ref2 = reference_forward(x2, w1, b1)
    out2 = jax.block_until_ready(aud_model_forward(x2, w1, b1, batch_tile=8))
    assert out2.shape == (B2, 1)
    assert jnp.allclose(out2, ref2, atol=1e-5, rtol=1e-5)

    # Case 3: D=48 (does not divide 128) -> generic VPU path, ragged 2-step grid.
    B3, D3 = 20, 48
    x3 = jax.random.normal(k_x3, (B3, D3), jnp.float32)
    w3, b3 = init_params(D3, k_p2)
    ref3 = reference_forward(x3, w3, b3)
    out3 = jax.block_until_ready(aud_model_forward(x3, w3, b3))
    assert out3.shape == (B3, 1)
    assert jnp.allclose(out3, ref3, atol=1e-5, rtol=1e-5)

    print("KERNEL_OK")
</pallas_src>

<mosaic_0001>
module attributes {stable_mosaic.version = 11 : i64} {
  func.func @_packed_kernel(%arg0: i32, %arg1: memref<5x128xf32, #tpu.memory_space<vmem>>, %arg2: memref<128x4xf32, #tpu.memory_space<vmem>>, %arg3: memref<1xf32, #tpu.memory_space<smem>>, %arg4: memref<5x4xf32, #tpu.memory_space<vmem>>) attributes {dimension_semantics = [#tpu.dimension_semantics<parallel>], iteration_bounds = array<i64: 1>, scalar_prefetch = 0 : i64, scratch_operands = 0 : i64, tpu.core_type = #tpu.core_type<tc>, window_params = [{transform_indices = @transform_0, window_bounds = array<i64: 5, 128>}, {pipeline_mode = #tpu.pipeline_mode<synchronous>, transform_indices = @transform_1, window_bounds = array<i64: 128, 4>}, {transform_indices = @transform_2, window_bounds = array<i64: 1>}, {transform_indices = @transform_3, window_bounds = array<i64: 5, 4>}]} {
    %c0 = arith.constant 0 : index
    %c0_0 = arith.constant 0 : index
    %0 = vector.load %arg1[%c0, %c0_0] : memref<5x128xf32, #tpu.memory_space<vmem>>, vector<5x128xf32>
    %c0_1 = arith.constant 0 : index
    %c0_2 = arith.constant 0 : index
    %1 = vector.load %arg2[%c0_1, %c0_2] : memref<128x4xf32, #tpu.memory_space<vmem>>, vector<128x4xf32>
    %cst = arith.constant dense<0.000000e+00> : vector<5x4xf32>
    %2 = tpu.matmul %0, %1, %cst {dimension_numbers = #tpu.dot_dimension_numbers<[1], [0], [0], [1], [0, 0, 1, 1], [], []>} : vector<5x128xf32>, vector<128x4xf32>, vector<5x4xf32> -> vector<5x4xf32>
    %c0_3 = arith.constant 0 : index
    %3 = memref.load %arg3[%c0_3] : memref<1xf32, #tpu.memory_space<smem>>
    %4 = vector.broadcast %3 : f32 to vector<5x4xf32>
    %5 = arith.addf %2, %4 : vector<5x4xf32>
    %6 = arith.negf %5 : vector<5x4xf32>
    %7 = math.exp %6 : vector<5x4xf32>
    %cst_4 = arith.constant 1.000000e+00 : f32
    %8 = vector.broadcast %cst_4 : f32 to vector<5x4xf32>
    %9 = arith.addf %8, %7 : vector<5x4xf32>
    %10 = arith.divf %8, %9 : vector<5x4xf32>
    %c0_5 = arith.constant 0 : index
    %c0_6 = arith.constant 0 : index
    %11 = vector.load %arg4[%c0_5, %c0_6] : memref<5x4xf32, #tpu.memory_space<vmem>>, vector<5x4xf32>
    tpu.vector_store %arg4[%c0_5, %c0_6], %10 {strides = array<i32>} : memref<5x4xf32, #tpu.memory_space<vmem>>, vector<5x4xf32>,
    return
  }
  func.func @transform_0(%arg0: i32) -> (i32, i32) {
    %c0_i32 = arith.constant 0 : i32
    %c0_i32_0 = arith.constant 0 : i32
    return %arg0, %c0_i32 : i32, i32
  }
  func.func @transform_1(%arg0: i32) -> (i32, i32) {
    %c0_i32 = arith.constant 0 : i32
    %c0_i32_0 = arith.constant 0 : i32
    %c0_i32_1 = arith.constant 0 : i32
    return %c0_i32, %c0_i32_0 : i32, i32
  }
  func.func @transform_2(%arg0: i32) -> i32 {
    %c0_i32 = arith.constant 0 : i32
    %c0_i32_0 = arith.constant 0 : i32
    return %c0_i32 : i32
  }
  func.func @transform_3(%arg0: i32) -> (i32, i32) {
    %c0_i32 = arith.constant 0 : i32
    %c0_i32_0 = arith.constant 0 : i32
    return %arg0, %c0_i32 : i32, i32
  }
}

</mosaic_0001>

<bundles_post_ra>
// kernel: tpu_custom_call.1
= control target key start
LH: loop header
LB: loop body
LE: loop exit
PB: predicated region body
PF: predicated region fallthrough
CT: control target
= control target key end

     0   :  { %v200_v0 = vmov 0.0|0.0   ;;  %vm201_vm0 = vmmov 0   ;;  %v202_v4 = vmov 0.0   ;;  %vm110_vm1 = vcmask 28672   ;;  %s280_s1 = inlined_call_operand.vmem [shape: f32[128,4], index: 1, kind: input, shape index: {}]   ;;  %s281_s0 = inlined_call_operand.vmem [shape: f32[5,128], index: 0, kind: input, shape index: {}]   ;;  %s282_s2 = inlined_call_operand.<no memory space> [shape: f32[1], index: 2, kind: input, shape index: {}]   ;;  %s283_s3 = inlined_call_operand.vmem [shape: f32[5,4], index: 3, kind: output, shape index: {}]  }
   0x1   :  { %169 = vmatprep.subr.bf16.mxu0 %v200_v0  ;;  %v16_v1 = vld [vmem:[%s280_s1] sm:$0xff]  ;;  %v17_v2 = vld [vmem:[%s280_s1 + $0x8] sm:$0xff]  ;;  %v18_v3 = vld [vmem:[%s280_s1 + $0x10] sm:$0xff]  ;;  %166 = vmatprep.mubr.msk.f32.mxu0 %vm201_vm0, %v202_v4  ;;  %v33_v27 = vstv %s282_s2 }
   0x2   :  { %v170_v5 = vpack.c.bf16 %v17_v2, %v16_v1  ;;  %v19_v6 = vld [vmem:[%s280_s1 + $0x18] sm:$0xff]  ;;  %v20_v8 = vld [vmem:[%s280_s1 + $0x20] sm:$0xff]  ;;  %v21_v9 = vld [vmem:[%s280_s1 + $0x28] sm:$0xff] }
   0x3   :  { %v173_v7 = vpack.c.bf16 %v19_v6, %v18_v3  ;;  %v176_v10 = vpack.c.bf16 %v21_v9, %v20_v8  ;;  %v22_v11 = vld [vmem:[%s280_s1 + $0x30] sm:$0xff]  ;;  %v23_v12 = vld [vmem:[%s280_s1 + $0x38] sm:$0xff]  ;;  %v24_v14 = vld [vmem:[%s280_s1 + $0x40] sm:$0xff] }
   0x4   :  { %171 = vmatpush3.bf16.msra.mxu0 %v170_v5  ;;  %v179_v13 = vpack.c.bf16 %v23_v12, %v22_v11  ;;  %v25_v15 = vld [vmem:[%s280_s1 + $0x48] sm:$0xff]  ;;  %v26_v17 = vld [vmem:[%s280_s1 + $0x50] sm:$0xff]  ;;  %v27_v18 = vld [vmem:[%s280_s1 + $0x58] sm:$0xff] }
   0x5   :  { %172 = vmatprep.subr.bf16.mxu0 %v200_v0  ;;  %v182_v16 = vpack.c.bf16 %v25_v15, %v24_v14  ;;  %v185_v19 = vpack.c.bf16 %v27_v18, %v26_v17  ;;  %v28_v20 = vld [vmem:[%s280_s1 + $0x60] sm:$0xff]  ;;  %v29_v21 = vld [vmem:[%s280_s1 + $0x68] sm:$0xff]  ;;  %v30_v23 = vld [vmem:[%s280_s1 + $0x70] sm:$0xff] }
   0x6   :  { %v188_v22 = vpack.c.bf16 %v29_v21, %v28_v20  ;;  %v31_v24 = vld [vmem:[%s280_s1 + $0x78] sm:$0xff]  ;;  %v15_v26 = vld [vmem:[%s281_s0] sm:$0x1f] }
   0x7   :  { %v191_v25 = vpack.c.bf16 %v31_v24, %v30_v23 }
   0x8   :  { %174 = vmatpush3.bf16.msra.mxu0 %v173_v7 }
   0x9   :  { %175 = vmatprep.subr.bf16.mxu0 %v200_v0 }
   0xc   :  { %177 = vmatpush3.bf16.msra.mxu0 %v176_v10 }
   0xd   :  { %178 = vmatprep.subr.bf16.mxu0 %v200_v0 }
  0x10   :  { %180 = vmatpush3.bf16.msra.mxu0 %v179_v13 }
  0x11   :  { %181 = vmatprep.subr.bf16.mxu0 %v200_v0 }
  0x14   :  { %183 = vmatpush3.bf16.msra.mxu0 %v182_v16 }
  0x15   :  { %184 = vmatprep.subr.bf16.mxu0 %v200_v0 }
  0x18   :  { %186 = vmatpush3.bf16.msra.mxu0 %v185_v19 }
  0x19   :  { %187 = vmatprep.subr.bf16.mxu0 %v200_v0 }
  0x1c   :  { %189 = vmatpush3.bf16.msra.mxu0 %v188_v22 }
  0x1d   :  { %190 = vmatprep.subr.bf16.mxu0 %v200_v0 }
  0x20   :  { %192 = vmatpush3.bf16.msra.mxu0 %v191_v25 }
  0x23   :  { %167 = vmatmul.mubr.f32.vlgmr.msra.gmra.mrb[0].mxu0 %v15_v26 }
  0xf6   :  { %v100_v28 = vpop.f32.mrb[0].mxu0 }
  0xf7   :  { %v101_v29 = vadd.f32 %v100_v28, %v33_v27  ;;  %v168_v30 = vpop.f32.mrb[1].mxu0 }
  0xf9   :  { %v116_v31 = vmul.f32 -1.442695, %v101_v29 }
  0xfb   :  { %196 = vpow2.f32 %v116_v31 }
 0x105   :  { %v197_v32 = vpop.eup %196 }
 0x106   :  { %v107_v33 = vadd.f32 1.0, %v197_v32 }
 0x108   :  { %198 = vrcp.f32 %v107_v33 }
 0x112   :  { %v199_v34 = vpop.eup %198 }
 0x113   :  { %111 = vst.msk [vmem:[%s283_s3] sm:$0x1f] %vm110_vm1, %v199_v34 }

</bundles_post_ra>
